<compile_context>
chip_gen: v7x
topology: tpu7x:2x2x1
jax: 0.10.0
libtpu: 0.0.40
codegen_flags: <defaults>
</compile_context>

<pallas_src>
import functools

import jax
import jax.numpy as jnp
from jax.experimental import pallas as pl
from jax.experimental.pallas import tpu as pltpu


def _round_up(x, m):
    return ((x + m - 1) // m) * m


def _layer_norm(x, g, b, eps=1e-5, n=None):
    """One-pass LayerNorm. `n` overrides the divisor when the lane axis carries
    zero padding (padded lanes contribute 0 to both sums, padded gamma/beta are
    0 so padded output lanes stay exactly 0)."""
    if n is None:
        n = x.shape[-1]
    inv_n = 1.0 / float(n)
    s1 = jnp.sum(x, axis=-1, keepdims=True)
    s2 = jnp.sum(x * x, axis=-1, keepdims=True)
    mean = s1 * inv_n
    var = jnp.maximum(s2 * inv_n - mean * mean, 0.0)
    return (x - mean) * jax.lax.rsqrt(var + eps) * g + b


def r_critic_kernel(
    obs_ref, h0_ref, mask_ref,
    ln0g_ref, ln0b_ref,
    w1_ref, b1_ref, ln1g_ref, ln1b_ref,
    w2_ref, b2_ref, ln2g_ref, ln2b_ref,
    wg_ref, bg_ref,
    lnrg_ref, lnrb_ref,
    wv_ref, bv_ref,
    out_ref,
    *, hidden, gate_pad,
):
    H, GP = hidden, gate_pad
    bf16 = jnp.bfloat16

    # ---- MLPBase: feature LN -> fc1 -> fc2 (bf16 MXU operands, f32 accumulate).
    # All post-fc activations are (B, GP) with lanes H..GP-1 exactly 0.
    x = _layer_norm(obs_ref[...], ln0g_ref[...], ln0b_ref[...])
    x = jnp.dot(x.astype(bf16), w1_ref[...],
                preferred_element_type=jnp.float32) + b1_ref[...]
    x = _layer_norm(jnp.maximum(x, 0.0), ln1g_ref[...], ln1b_ref[...], n=H)
    x = jnp.dot(x.astype(bf16), w2_ref[...],
                preferred_element_type=jnp.float32) + b2_ref[...]
    x = _layer_norm(jnp.maximum(x, 0.0), ln2g_ref[...], ln2b_ref[...], n=H)

    # ---- RNNLayer: single GRU step, all gates in ONE fused matmul.
    # h0 is pre-padded to GP lanes in the wrapper, so the concat sits on
    # vreg boundaries and no in-kernel zero-splat/stitch is needed.
    h = h0_ref[...] * mask_ref[...]                          # (B, GP), padded lanes 0
    xh = jnp.concatenate([x, h], axis=-1).astype(bf16)       # (B, 2*GP)
    g = jnp.dot(xh, wg_ref[...],
                preferred_element_type=jnp.float32) + bg_ref[...]   # (B, 4*GP)

    # Gate groups are 128-lane aligned; padded columns/biases are exact zeros.
    r = jax.nn.sigmoid(g[:, 0 * GP:1 * GP])
    z = jax.nn.sigmoid(g[:, 1 * GP:2 * GP])
    n = jnp.tanh(g[:, 2 * GP:3 * GP] + r * g[:, 3 * GP:4 * GP])
    h_new = (1.0 - z) * n + z * h                            # padded lanes exactly 0

    # LayerNorm over the H real lanes (padded gamma/beta = 0 -> padded feat = 0).
    feat = _layer_norm(h_new, lnrg_ref[...], lnrb_ref[...], n=H)

    # ---- v_out: N=1 head as VPU multiply + cross-lane reduce (no MXU trip).
    val = jnp.sum(feat * wv_ref[...], axis=-1, keepdims=True) + bv_ref[...]  # (B,1)

    # ---- Lane-dense output slab: lanes 0..H-1 = h_new, lane H = value.
    lane = jax.lax.broadcasted_iota(jnp.int32, (1, GP), 1)
    vmask = (lane == H).astype(jnp.float32)
    out_ref[...] = h_new * (1.0 - vmask) + val * vmask


def pack_critic_params(p):
    """Convert plain (PyTorch-layout, pre-transposed) f32 params into the fused
    kernel layout: bf16 matmul weights padded to 128-lane activation width,
    one packed GRU weight/bias with 128-lane-aligned gate groups, padded
    LayerNorm / value-head params."""
    D, H = p["w1"].shape
    GP = _round_up(H, 128)                  # padded activation / gate group width
    bf16 = jnp.bfloat16

    def pad_cols(m, width):
        return jnp.pad(m, ((0, 0), (0, width - m.shape[1])))

    def pad_rows(m, height):
        return jnp.pad(m, ((0, height - m.shape[0]), (0, 0)))

    w1 = pad_cols(p["w1"], GP)                              # (D, GP)
    w2 = pad_rows(pad_cols(p["w2"], GP), GP)                # (GP, GP)

    wih, whh = p["w_ih"], p["w_hh"]                         # (H, 3H), cols [r|z|n]
    bih = p["b_ih"].reshape(-1)
    bhh = p["b_hh"].reshape(-1)

    def col(w, k):
        return w[:, k * H:(k + 1) * H]

    zHH = jnp.zeros((H, H), jnp.float32)

    def group(wx, wh):                                      # -> (2*GP, GP)
        gx = pad_rows(wx, GP)                               # x-part rows
        gh = pad_rows(wh, GP)                               # h-part rows
        return pad_cols(jnp.concatenate([gx, gh], axis=0), GP)

    w_gru = jnp.concatenate([
        group(col(wih, 0), col(whh, 0)),                    # r
        group(col(wih, 1), col(whh, 1)),                    # z
        group(col(wih, 2), zHH),                            # n (input part)
        group(zHH, col(whh, 2)),                            # n (hidden part)
    ], axis=1)                                              # (2*GP, 4*GP)

    def pad_vec(v):
        return jnp.pad(v, (0, GP - H)).reshape(1, GP)

    b_gru = jnp.concatenate([
        pad_vec(bih[0:H] + bhh[0:H]),                       # r: b_ih_r + b_hh_r
        pad_vec(bih[H:2 * H] + bhh[H:2 * H]),               # z: b_ih_z + b_hh_z
        pad_vec(bih[2 * H:3 * H]),                          # n (input):  b_ih_n
        pad_vec(bhh[2 * H:3 * H]),                          # n (hidden): b_hh_n
    ], axis=1)                                              # (1, 4*GP)

    pad_p = lambda a: pad_cols(a, GP)                       # (1,H) -> (1,GP)

    return {
        "hidden": H, "gate_pad": GP, "obs_dim": D,
        "ln0_g": p["ln0_g"], "ln0_b": p["ln0_b"],
        "w1": w1.astype(bf16), "b1": pad_p(p["b1"]),
        "ln1_g": pad_p(p["ln1_g"]), "ln1_b": pad_p(p["ln1_b"]),
        "w2": w2.astype(bf16), "b2": pad_p(p["b2"]),
        "ln2_g": pad_p(p["ln2_g"]), "ln2_b": pad_p(p["ln2_b"]),
        "w_gru": w_gru.astype(bf16), "b_gru": b_gru,
        "lnr_g": pad_p(p["lnr_g"]), "lnr_b": pad_p(p["lnr_b"]),
        "wv": pad_p(p["wv"].reshape(1, H)),                 # (1, GP)
        "bv": p["bv"],                                      # (1, 1)
    }


def r_critic_forward(cent_obs, rnn_states, masks, packed, *, block_b=None,
                     debug_raw=False):
    """cent_obs: (B,D) f32; rnn_states: (B,1,H) f32; masks: (B,1) f32.
    Always uses the batch-tiled grid path; B is zero-padded to a multiple of
    block_b (auto-picked: multiple of 8, <= 512, targeting >= 4 grid steps)."""
    B, D = cent_obs.shape
    H, GP = packed["hidden"], packed["gate_pad"]

    if block_b is None:
        block_b = max(8, min(512, _round_up(pl.cdiv(B, 4), 8)))
    block_b = max(8, _round_up(int(block_b), 8))
    n_blocks = pl.cdiv(B, block_b)
    B_pad = n_blocks * block_b

    h0 = rnn_states.reshape(B, H)
    if B_pad != B:
        row_pad = ((0, B_pad - B), (0, 0))
        cent_obs = jnp.pad(cent_obs, row_pad)
        h0 = jnp.pad(h0, row_pad)
        masks = jnp.pad(masks, row_pad)
    h0_pad = jnp.pad(h0, ((0, 0), (0, GP - H))) if GP != H else h0

    args = (
        cent_obs, h0_pad, masks,
        packed["ln0_g"], packed["ln0_b"],
        packed["w1"], packed["b1"], packed["ln1_g"], packed["ln1_b"],
        packed["w2"], packed["b2"], packed["ln2_g"], packed["ln2_b"],
        packed["w_gru"], packed["b_gru"],
        packed["lnr_g"], packed["lnr_b"],
        packed["wv"], packed["bv"],
    )

    def tiled(a):
        return pl.BlockSpec((block_b, a.shape[1]), lambda i: (i, 0))

    def resident(a):
        return pl.BlockSpec(a.shape, lambda i: (0, 0))

    in_specs = [tiled(a) for a in args[:3]] + [resident(a) for a in args[3:]]

    weight_bytes = sum(int(a.size) * a.dtype.itemsize for a in args[3:])
    flops = 2 * B_pad * (D * GP + GP * GP + 2 * GP * 4 * GP) + 24 * B_pad * GP
    bytes_accessed = 4 * B_pad * (D + GP + 1 + GP) + weight_bytes
    transcendentals = 4 * B_pad * GP

    kernel = functools.partial(r_critic_kernel, hidden=H, gate_pad=GP)
    out = pl.pallas_call(
        kernel,
        out_shape=jax.ShapeDtypeStruct((B_pad, GP), jnp.float32),
        grid=(n_blocks,),
        in_specs=in_specs,
        out_specs=pl.BlockSpec((block_b, GP), lambda i: (i, 0)),
        compiler_params=pltpu.CompilerParams(
            dimension_semantics=("parallel",)),
        cost_estimate=pl.CostEstimate(
            flops=int(flops),
            transcendentals=int(transcendentals),
            bytes_accessed=int(bytes_accessed)),
    )(*args)

    values = out[:B, H:H + 1]
    h_out = out[:B, :H].reshape(B, 1, H)
    if debug_raw:
        return values, h_out, out
    return values, h_out


def _reference_forward(cent_obs, rnn_states, masks, params):
    """Pure-JAX reference mirroring the PyTorch module: standard two-pass
    LayerNorm, same bf16 matmul precision as the kernel."""
    bf16 = jnp.bfloat16

    def mm(a, w):
        return jnp.dot(a.astype(bf16), w.astype(bf16),
                       preferred_element_type=jnp.float32)

    def ln(x, g, b, eps=1e-5):
        mu = jnp.mean(x, axis=-1, keepdims=True)
        var = jnp.mean((x - mu) ** 2, axis=-1, keepdims=True)
        return (x - mu) * jax.lax.rsqrt(var + eps) * g + b

    x = ln(cent_obs, params["ln0_g"], params["ln0_b"])
    x = ln(jnp.maximum(mm(x, params["w1"]) + params["b1"], 0.0),
           params["ln1_g"], params["ln1_b"])
    x = ln(jnp.maximum(mm(x, params["w2"]) + params["b2"], 0.0),
           params["ln2_g"], params["ln2_b"])
    h = rnn_states[:, 0, :] * masks
    H = h.shape[-1]
    gi = mm(x, params["w_ih"]) + params["b_ih"]
    gh = mm(h, params["w_hh"]) + params["b_hh"]
    r = jax.nn.sigmoid(gi[:, :H] + gh[:, :H])
    z = jax.nn.sigmoid(gi[:, H:2 * H] + gh[:, H:2 * H])
    n = jnp.tanh(gi[:, 2 * H:] + r * gh[:, 2 * H:])
    h_new = (1.0 - z) * n + z * h
    feat = ln(h_new, params["lnr_g"], params["lnr_b"])
    values = feat @ params["wv"] + params["bv"]
    return values, h_new[:, None, :]


def make_params(key, obs_dim, hidden):
    """Deterministic synthetic parameters (no checkpoint load). Linear weights
    are pre-transposed to (in, out); GRU gate order is PyTorch's (r, z, n)."""
    ks = jax.random.split(key, 8)

    def dense(k, fan_in, fan_out):
        scale = 1.0 / jnp.sqrt(jnp.float32(fan_in))
        return jax.random.normal(k, (fan_in, fan_out), jnp.float32) * scale

    return {
        "ln0_g": jnp.ones((1, obs_dim), jnp.float32),
        "ln0_b": jnp.zeros((1, obs_dim), jnp.float32),
        "w1": dense(ks[0], obs_dim, hidden),
        "b1": jnp.zeros((1, hidden), jnp.float32),
        "ln1_g": jnp.ones((1, hidden), jnp.float32),
        "ln1_b": jnp.zeros((1, hidden), jnp.float32),
        "w2": dense(ks[1], hidden, hidden),
        "b2": jnp.zeros((1, hidden), jnp.float32),
        "ln2_g": jnp.ones((1, hidden), jnp.float32),
        "ln2_b": jnp.zeros((1, hidden), jnp.float32),
        "w_ih": dense(ks[2], hidden, 3 * hidden),
        "b_ih": jax.random.normal(ks[3], (1, 3 * hidden), jnp.float32) * 0.01,
        "w_hh": dense(ks[4], hidden, 3 * hidden),
        "b_hh": jax.random.normal(ks[5], (1, 3 * hidden), jnp.float32) * 0.01,
        "lnr_g": jnp.ones((1, hidden), jnp.float32),
        "lnr_b": jnp.zeros((1, hidden), jnp.float32),
        "wv": dense(ks[6], hidden, 1),
        "bv": jnp.zeros((1, 1), jnp.float32),
    }


if __name__ == "__main__":
    OBS_DIM, HIDDEN = 64, 64          # critic_hidden_size = 64, recurrent_N = 1
    ks = jax.random.split(jax.random.PRNGKey(0), 7)
    params = make_params(ks[3], OBS_DIM, HIDDEN)
    packed = pack_critic_params(params)

    # --- small batch: single grid step (B padded to one 8-row tile) ---
    B = 8
    cent_obs = jax.random.normal(ks[0], (B, OBS_DIM), jnp.float32)
    rnn_states = jax.random.normal(ks[1], (B, 1, HIDDEN), jnp.float32)
    masks = (jax.random.uniform(ks[2], (B, 1)) > 0.3).astype(jnp.float32)

    values, new_states, raw = jax.block_until_ready(
        r_critic_forward(cent_obs, rnn_states, masks, packed, debug_raw=True))
    ref_v, ref_s = _reference_forward(cent_obs, rnn_states, masks, params)
    assert values.shape == (B, 1) and new_states.shape == (B, 1, HIDDEN)
    assert jnp.allclose(values, ref_v, atol=1e-2, rtol=1e-2)
    assert jnp.allclose(new_states, ref_s, atol=1e-2, rtol=1e-2)
    # padded lanes beyond the value lane must be exactly zero (GRU/LN padding invariant)
    assert bool(jnp.all(raw[:, HIDDEN + 1:] == 0.0))

    # --- non-divisible batch: multi-step grid + zero-padded last tile ---
    B2 = 144
    obs2 = jax.random.normal(ks[4], (B2, OBS_DIM), jnp.float32)
    h2 = jax.random.normal(ks[5], (B2, 1, HIDDEN), jnp.float32)
    m2 = (jax.random.uniform(ks[6], (B2, 1)) > 0.3).astype(jnp.float32)

    v2, s2 = jax.block_until_ready(r_critic_forward(obs2, h2, m2, packed))
    rv2, rs2 = _reference_forward(obs2, h2, m2, params)
    assert v2.shape == (B2, 1) and s2.shape == (B2, 1, HIDDEN)
    assert jnp.allclose(v2, rv2, atol=1e-2, rtol=1e-2)
    assert jnp.allclose(s2, rs2, atol=1e-2, rtol=1e-2)

    print("KERNEL_OK")
</pallas_src>

<mosaic_0001>
module attributes {stable_mosaic.version = 11 : i64} {
  func.func @r_critic_kernel(%arg0: i32, %arg1: memref<8x64xf32, #tpu.memory_space<vmem>>, %arg2: memref<8x128xf32, #tpu.memory_space<vmem>>, %arg3: memref<8x1xf32, #tpu.memory_space<vmem>>, %arg4: memref<1x64xf32, #tpu.memory_space<vmem>>, %arg5: memref<1x64xf32, #tpu.memory_space<vmem>>, %arg6: memref<64x128xbf16, #tpu.memory_space<vmem>>, %arg7: memref<1x128xf32, #tpu.memory_space<vmem>>, %arg8: memref<1x128xf32, #tpu.memory_space<vmem>>, %arg9: memref<1x128xf32, #tpu.memory_space<vmem>>, %arg10: memref<128x128xbf16, #tpu.memory_space<vmem>>, %arg11: memref<1x128xf32, #tpu.memory_space<vmem>>, %arg12: memref<1x128xf32, #tpu.memory_space<vmem>>, %arg13: memref<1x128xf32, #tpu.memory_space<vmem>>, %arg14: memref<256x512xbf16, #tpu.memory_space<vmem>>, %arg15: memref<1x512xf32, #tpu.memory_space<vmem>>, %arg16: memref<1x128xf32, #tpu.memory_space<vmem>>, %arg17: memref<1x128xf32, #tpu.memory_space<vmem>>, %arg18: memref<1x128xf32, #tpu.memory_space<vmem>>, %arg19: memref<1x1xf32, #tpu.memory_space<vmem>>, %arg20: memref<8x128xf32, #tpu.memory_space<vmem>>) attributes {dimension_semantics = [#tpu.dimension_semantics<parallel>], iteration_bounds = array<i64: 1>, scalar_prefetch = 0 : i64, scratch_operands = 0 : i64, tpu.core_type = #tpu.core_type<tc>, window_params = [{transform_indices = @transform_0, window_bounds = array<i64: 8, 64>}, {transform_indices = @transform_1, window_bounds = array<i64: 8, 128>}, {transform_indices = @transform_2, window_bounds = array<i64: 8, 1>}, {pipeline_mode = #tpu.pipeline_mode<synchronous>, transform_indices = @transform_3, window_bounds = array<i64: 1, 64>}, {pipeline_mode = #tpu.pipeline_mode<synchronous>, transform_indices = @transform_4, window_bounds = array<i64: 1, 64>}, {pipeline_mode = #tpu.pipeline_mode<synchronous>, transform_indices = @transform_5, window_bounds = array<i64: 64, 128>}, {pipeline_mode = #tpu.pipeline_mode<synchronous>, transform_indices = @transform_6, window_bounds = array<i64: 1, 128>}, {pipeline_mode = #tpu.pipeline_mode<synchronous>, transform_indices = @transform_7, window_bounds = array<i64: 1, 128>}, {pipeline_mode = #tpu.pipeline_mode<synchronous>, transform_indices = @transform_8, window_bounds = array<i64: 1, 128>}, {pipeline_mode = #tpu.pipeline_mode<synchronous>, transform_indices = @transform_9, window_bounds = array<i64: 128, 128>}, {pipeline_mode = #tpu.pipeline_mode<synchronous>, transform_indices = @transform_10, window_bounds = array<i64: 1, 128>}, {pipeline_mode = #tpu.pipeline_mode<synchronous>, transform_indices = @transform_11, window_bounds = array<i64: 1, 128>}, {pipeline_mode = #tpu.pipeline_mode<synchronous>, transform_indices = @transform_12, window_bounds = array<i64: 1, 128>}, {pipeline_mode = #tpu.pipeline_mode<synchronous>, transform_indices = @transform_13, window_bounds = array<i64: 256, 512>}, {pipeline_mode = #tpu.pipeline_mode<synchronous>, transform_indices = @transform_14, window_bounds = array<i64: 1, 512>}, {pipeline_mode = #tpu.pipeline_mode<synchronous>, transform_indices = @transform_15, window_bounds = array<i64: 1, 128>}, {pipeline_mode = #tpu.pipeline_mode<synchronous>, transform_indices = @transform_16, window_bounds = array<i64: 1, 128>}, {pipeline_mode = #tpu.pipeline_mode<synchronous>, transform_indices = @transform_17, window_bounds = array<i64: 1, 128>}, {pipeline_mode = #tpu.pipeline_mode<synchronous>, transform_indices = @transform_18, window_bounds = array<i64: 1, 1>}, {transform_indices = @transform_19, window_bounds = array<i64: 8, 128>}]} {
    %c0 = arith.constant 0 : index
    %c0_0 = arith.constant 0 : index
    %0 = vector.load %arg1[%c0, %c0_0] : memref<8x64xf32, #tpu.memory_space<vmem>>, vector<8x64xf32>
    %c0_1 = arith.constant 0 : index
    %c0_2 = arith.constant 0 : index
    %1 = vector.load %arg4[%c0_1, %c0_2] : memref<1x64xf32, #tpu.memory_space<vmem>>, vector<1x64xf32>
    %c0_3 = arith.constant 0 : index
    %c0_4 = arith.constant 0 : index
    %2 = vector.load %arg5[%c0_3, %c0_4] : memref<1x64xf32, #tpu.memory_space<vmem>>, vector<1x64xf32>
    %cst = arith.constant dense<0.000000e+00> : vector<8xf32>
    %3 = vector.multi_reduction <add>, %0, %cst [1] : vector<8x64xf32> to vector<8xf32>
    %4 = vector.shape_cast %3 : vector<8xf32> to vector<8x1xf32>
    %5 = arith.mulf %0, %0 : vector<8x64xf32>
    %cst_5 = arith.constant dense<0.000000e+00> : vector<8xf32>
    %6 = vector.multi_reduction <add>, %5, %cst_5 [1] : vector<8x64xf32> to vector<8xf32>
    %7 = vector.shape_cast %6 : vector<8xf32> to vector<8x1xf32>
    %cst_6 = arith.constant 1.562500e-02 : f32
    %8 = vector.broadcast %cst_6 : f32 to vector<8x1xf32>
    %9 = arith.mulf %4, %8 : vector<8x1xf32>
    %cst_7 = arith.constant 1.562500e-02 : f32
    %10 = vector.broadcast %cst_7 : f32 to vector<8x1xf32>
    %11 = arith.mulf %7, %10 : vector<8x1xf32>
    %12 = arith.mulf %9, %9 : vector<8x1xf32>
    %13 = arith.subf %11, %12 : vector<8x1xf32>
    %cst_8 = arith.constant 0.000000e+00 : f32
    %14 = vector.broadcast %cst_8 : f32 to vector<8x1xf32>
    %15 = arith.maximumf %13, %14 : vector<8x1xf32>
    %16 = vector.broadcast %9 : vector<8x1xf32> to vector<8x64xf32>
    %17 = arith.subf %0, %16 : vector<8x64xf32>
    %cst_9 = arith.constant 9.99999974E-6 : f32
    %18 = vector.broadcast %cst_9 : f32 to vector<8x1xf32>
    %19 = arith.addf %15, %18 : vector<8x1xf32>
    %20 = math.rsqrt %19 : vector<8x1xf32>
    %21 = vector.broadcast %20 : vector<8x1xf32> to vector<8x64xf32>
    %22 = arith.mulf %17, %21 : vector<8x64xf32>
    %23 = vector.broadcast %1 : vector<1x64xf32> to vector<8x64xf32>
    %24 = arith.mulf %22, %23 : vector<8x64xf32>
    %25 = vector.broadcast %2 : vector<1x64xf32> to vector<8x64xf32>
    %26 = arith.addf %24, %25 : vector<8x64xf32>
    %27 = arith.truncf %26 : vector<8x64xf32> to vector<8x64xbf16>
    %c0_10 = arith.constant 0 : index
    %c0_11 = arith.constant 0 : index
    %28 = vector.load %arg6[%c0_10, %c0_11] : memref<64x128xbf16, #tpu.memory_space<vmem>>, vector<64x128xbf16>
    %cst_12 = arith.constant dense<0.000000e+00> : vector<8x128xf32>
    %29 = tpu.matmul %27, %28, %cst_12 {dimension_numbers = #tpu.dot_dimension_numbers<[1], [0], [0], [1], [0, 0, 1, 1], [], []>} : vector<8x64xbf16>, vector<64x128xbf16>, vector<8x128xf32> -> vector<8x128xf32>
    %c0_13 = arith.constant 0 : index
    %c0_14 = arith.constant 0 : index
    %30 = vector.load %arg7[%c0_13, %c0_14] : memref<1x128xf32, #tpu.memory_space<vmem>>, vector<1x128xf32>
    %31 = vector.broadcast %30 : vector<1x128xf32> to vector<8x128xf32>
    %32 = arith.addf %29, %31 : vector<8x128xf32>
    %cst_15 = arith.constant 0.000000e+00 : f32
    %33 = vector.broadcast %cst_15 : f32 to vector<8x128xf32>
    %34 = arith.maximumf %32, %33 : vector<8x128xf32>
    %c0_16 = arith.constant 0 : index
    %c0_17 = arith.constant 0 : index
    %35 = vector.load %arg8[%c0_16, %c0_17] : memref<1x128xf32, #tpu.memory_space<vmem>>, vector<1x128xf32>
    %c0_18 = arith.constant 0 : index
    %c0_19 = arith.constant 0 : index
    %36 = vector.load %arg9[%c0_18, %c0_19] : memref<1x128xf32, #tpu.memory_space<vmem>>, vector<1x128xf32>
    %cst_20 = arith.constant dense<0.000000e+00> : vector<8xf32>
    %37 = vector.multi_reduction <add>, %34, %cst_20 [1] : vector<8x128xf32> to vector<8xf32>
    %38 = vector.shape_cast %37 : vector<8xf32> to vector<8x1xf32>
    %39 = arith.mulf %34, %34 : vector<8x128xf32>
    %cst_21 = arith.constant dense<0.000000e+00> : vector<8xf32>
    %40 = vector.multi_reduction <add>, %39, %cst_21 [1] : vector<8x128xf32> to vector<8xf32>
    %41 = vector.shape_cast %40 : vector<8xf32> to vector<8x1xf32>
    %cst_22 = arith.constant 1.562500e-02 : f32
    %42 = vector.broadcast %cst_22 : f32 to vector<8x1xf32>
    %43 = arith.mulf %38, %42 : vector<8x1xf32>
    %cst_23 = arith.constant 1.562500e-02 : f32
    %44 = vector.broadcast %cst_23 : f32 to vector<8x1xf32>
    %45 = arith.mulf %41, %44 : vector<8x1xf32>
    %46 = arith.mulf %43, %43 : vector<8x1xf32>
    %47 = arith.subf %45, %46 : vector<8x1xf32>
    %cst_24 = arith.constant 0.000000e+00 : f32
    %48 = vector.broadcast %cst_24 : f32 to vector<8x1xf32>
    %49 = arith.maximumf %47, %48 : vector<8x1xf32>
    %50 = vector.broadcast %43 : vector<8x1xf32> to vector<8x128xf32>
    %51 = arith.subf %34, %50 : vector<8x128xf32>
    %cst_25 = arith.constant 9.99999974E-6 : f32
    %52 = vector.broadcast %cst_25 : f32 to vector<8x1xf32>
    %53 = arith.addf %49, %52 : vector<8x1xf32>
    %54 = math.rsqrt %53 : vector<8x1xf32>
    %55 = vector.broadcast %54 : vector<8x1xf32> to vector<8x128xf32>
    %56 = arith.mulf %51, %55 : vector<8x128xf32>
    %57 = vector.broadcast %35 : vector<1x128xf32> to vector<8x128xf32>
    %58 = arith.mulf %56, %57 : vector<8x128xf32>
    %59 = vector.broadcast %36 : vector<1x128xf32> to vector<8x128xf32>
    %60 = arith.addf %58, %59 : vector<8x128xf32>
    %61 = arith.truncf %60 : vector<8x128xf32> to vector<8x128xbf16>
    %c0_26 = arith.constant 0 : index
    %c0_27 = arith.constant 0 : index
    %62 = vector.load %arg10[%c0_26, %c0_27] : memref<128x128xbf16, #tpu.memory_space<vmem>>, vector<128x128xbf16>
    %cst_28 = arith.constant dense<0.000000e+00> : vector<8x128xf32>
    %63 = tpu.matmul %61, %62, %cst_28 {dimension_numbers = #tpu.dot_dimension_numbers<[1], [0], [0], [1], [0, 0, 1, 1], [], []>} : vector<8x128xbf16>, vector<128x128xbf16>, vector<8x128xf32> -> vector<8x128xf32>
    %c0_29 = arith.constant 0 : index
    %c0_30 = arith.constant 0 : index
    %64 = vector.load %arg11[%c0_29, %c0_30] : memref<1x128xf32, #tpu.memory_space<vmem>>, vector<1x128xf32>
    %65 = vector.broadcast %64 : vector<1x128xf32> to vector<8x128xf32>
    %66 = arith.addf %63, %65 : vector<8x128xf32>
    %cst_31 = arith.constant 0.000000e+00 : f32
    %67 = vector.broadcast %cst_31 : f32 to vector<8x128xf32>
    %68 = arith.maximumf %66, %67 : vector<8x128xf32>
    %c0_32 = arith.constant 0 : index
    %c0_33 = arith.constant 0 : index
    %69 = vector.load %arg12[%c0_32, %c0_33] : memref<1x128xf32, #tpu.memory_space<vmem>>, vector<1x128xf32>
    %c0_34 = arith.constant 0 : index
    %c0_35 = arith.constant 0 : index
    %70 = vector.load %arg13[%c0_34, %c0_35] : memref<1x128xf32, #tpu.memory_space<vmem>>, vector<1x128xf32>
    %cst_36 = arith.constant dense<0.000000e+00> : vector<8xf32>
    %71 = vector.multi_reduction <add>, %68, %cst_36 [1] : vector<8x128xf32> to vector<8xf32>
    %72 = vector.shape_cast %71 : vector<8xf32> to vector<8x1xf32>
    %73 = arith.mulf %68, %68 : vector<8x128xf32>
    %cst_37 = arith.constant dense<0.000000e+00> : vector<8xf32>
    %74 = vector.multi_reduction <add>, %73, %cst_37 [1] : vector<8x128xf32> to vector<8xf32>
    %75 = vector.shape_cast %74 : vector<8xf32> to vector<8x1xf32>
    %cst_38 = arith.constant 1.562500e-02 : f32
    %76 = vector.broadcast %cst_38 : f32 to vector<8x1xf32>
    %77 = arith.mulf %72, %76 : vector<8x1xf32>
    %cst_39 = arith.constant 1.562500e-02 : f32
    %78 = vector.broadcast %cst_39 : f32 to vector<8x1xf32>
    %79 = arith.mulf %75, %78 : vector<8x1xf32>
    %80 = arith.mulf %77, %77 : vector<8x1xf32>
    %81 = arith.subf %79, %80 : vector<8x1xf32>
    %cst_40 = arith.constant 0.000000e+00 : f32
    %82 = vector.broadcast %cst_40 : f32 to vector<8x1xf32>
    %83 = arith.maximumf %81, %82 : vector<8x1xf32>
    %84 = vector.broadcast %77 : vector<8x1xf32> to vector<8x128xf32>
    %85 = arith.subf %68, %84 : vector<8x128xf32>
    %cst_41 = arith.constant 9.99999974E-6 : f32
    %86 = vector.broadcast %cst_41 : f32 to vector<8x1xf32>
    %87 = arith.addf %83, %86 : vector<8x1xf32>
    %88 = math.rsqrt %87 : vector<8x1xf32>
    %89 = vector.broadcast %88 : vector<8x1xf32> to vector<8x128xf32>
    %90 = arith.mulf %85, %89 : vector<8x128xf32>
    %91 = vector.broadcast %69 : vector<1x128xf32> to vector<8x128xf32>
    %92 = arith.mulf %90, %91 : vector<8x128xf32>
    %93 = vector.broadcast %70 : vector<1x128xf32> to vector<8x128xf32>
    %94 = arith.addf %92, %93 : vector<8x128xf32>
    %c0_42 = arith.constant 0 : index
    %c0_43 = arith.constant 0 : index
    %95 = vector.load %arg2[%c0_42, %c0_43] : memref<8x128xf32, #tpu.memory_space<vmem>>, vector<8x128xf32>
    %c0_44 = arith.constant 0 : index
    %c0_45 = arith.constant 0 : index
    %96 = vector.load %arg3[%c0_44, %c0_45] : memref<8x1xf32, #tpu.memory_space<vmem>>, vector<8x1xf32>
    %97 = vector.broadcast %96 : vector<8x1xf32> to vector<8x128xf32>
    %98 = arith.mulf %95, %97 : vector<8x128xf32>
    %99 = tpu.concatenate %94, %98 in 1 : vector<8x128xf32>, vector<8x128xf32> -> vector<8x256xf32>
    %100 = arith.truncf %99 : vector<8x256xf32> to vector<8x256xbf16>
    %c0_46 = arith.constant 0 : index
    %c0_47 = arith.constant 0 : index
    %101 = vector.load %arg14[%c0_46, %c0_47] : memref<256x512xbf16, #tpu.memory_space<vmem>>, vector<256x512xbf16>
    %cst_48 = arith.constant dense<0.000000e+00> : vector<8x512xf32>
    %102 = tpu.matmul %100, %101, %cst_48 {dimension_numbers = #tpu.dot_dimension_numbers<[1], [0], [0], [1], [0, 0, 1, 1], [], []>} : vector<8x256xbf16>, vector<256x512xbf16>, vector<8x512xf32> -> vector<8x512xf32>
    %c0_49 = arith.constant 0 : index
    %c0_50 = arith.constant 0 : index
    %103 = vector.load %arg15[%c0_49, %c0_50] : memref<1x512xf32, #tpu.memory_space<vmem>>, vector<1x512xf32>
    %104 = vector.broadcast %103 : vector<1x512xf32> to vector<8x512xf32>
    %105 = arith.addf %102, %104 : vector<8x512xf32>
    %106 = vector.extract_strided_slice %105 {offsets = [0, 0], sizes = [8, 128], strides = [1, 1]} : vector<8x512xf32> to vector<8x128xf32>
    %107 = arith.negf %106 : vector<8x128xf32>
    %108 = math.exp %107 : vector<8x128xf32>
    %cst_51 = arith.constant 1.000000e+00 : f32
    %109 = vector.broadcast %cst_51 : f32 to vector<8x128xf32>
    %110 = arith.addf %109, %108 : vector<8x128xf32>
    %111 = arith.divf %109, %110 : vector<8x128xf32>
    %112 = vector.extract_strided_slice %105 {offsets = [0, 128], sizes = [8, 128], strides = [1, 1]} : vector<8x512xf32> to vector<8x128xf32>
    %113 = arith.negf %112 : vector<8x128xf32>
    %114 = math.exp %113 : vector<8x128xf32>
    %cst_52 = arith.constant 1.000000e+00 : f32
    %115 = vector.broadcast %cst_52 : f32 to vector<8x128xf32>
    %116 = arith.addf %115, %114 : vector<8x128xf32>
    %117 = arith.divf %115, %116 : vector<8x128xf32>
    %118 = vector.extract_strided_slice %105 {offsets = [0, 256], sizes = [8, 128], strides = [1, 1]} : vector<8x512xf32> to vector<8x128xf32>
    %119 = vector.extract_strided_slice %105 {offsets = [0, 384], sizes = [8, 128], strides = [1, 1]} : vector<8x512xf32> to vector<8x128xf32>
    %120 = arith.mulf %111, %119 : vector<8x128xf32>
    %121 = arith.addf %118, %120 : vector<8x128xf32>
    %122 = math.tanh %121 : vector<8x128xf32>
    %cst_53 = arith.constant 1.000000e+00 : f32
    %123 = vector.broadcast %cst_53 : f32 to vector<8x128xf32>
    %124 = arith.subf %123, %117 : vector<8x128xf32>
    %125 = arith.mulf %124, %122 : vector<8x128xf32>
    %126 = arith.mulf %117, %98 : vector<8x128xf32>
    %127 = arith.addf %125, %126 : vector<8x128xf32>
    %c0_54 = arith.constant 0 : index
    %c0_55 = arith.constant 0 : index
    %128 = vector.load %arg16[%c0_54, %c0_55] : memref<1x128xf32, #tpu.memory_space<vmem>>, vector<1x128xf32>
    %c0_56 = arith.constant 0 : index
    %c0_57 = arith.constant 0 : index
    %129 = vector.load %arg17[%c0_56, %c0_57] : memref<1x128xf32, #tpu.memory_space<vmem>>, vector<1x128xf32>
    %cst_58 = arith.constant dense<0.000000e+00> : vector<8xf32>
    %130 = vector.multi_reduction <add>, %127, %cst_58 [1] : vector<8x128xf32> to vector<8xf32>
    %131 = vector.shape_cast %130 : vector<8xf32> to vector<8x1xf32>
    %132 = arith.mulf %127, %127 : vector<8x128xf32>
    %cst_59 = arith.constant dense<0.000000e+00> : vector<8xf32>
    %133 = vector.multi_reduction <add>, %132, %cst_59 [1] : vector<8x128xf32> to vector<8xf32>
    %134 = vector.shape_cast %133 : vector<8xf32> to vector<8x1xf32>
    %cst_60 = arith.constant 1.562500e-02 : f32
    %135 = vector.broadcast %cst_60 : f32 to vector<8x1xf32>
    %136 = arith.mulf %131, %135 : vector<8x1xf32>
    %cst_61 = arith.constant 1.562500e-02 : f32
    %137 = vector.broadcast %cst_61 : f32 to vector<8x1xf32>
    %138 = arith.mulf %134, %137 : vector<8x1xf32>
    %139 = arith.mulf %136, %136 : vector<8x1xf32>
    %140 = arith.subf %138, %139 : vector<8x1xf32>
    %cst_62 = arith.constant 0.000000e+00 : f32
    %141 = vector.broadcast %cst_62 : f32 to vector<8x1xf32>
    %142 = arith.maximumf %140, %141 : vector<8x1xf32>
    %143 = vector.broadcast %136 : vector<8x1xf32> to vector<8x128xf32>
    %144 = arith.subf %127, %143 : vector<8x128xf32>
    %cst_63 = arith.constant 9.99999974E-6 : f32
    %145 = vector.broadcast %cst_63 : f32 to vector<8x1xf32>
    %146 = arith.addf %142, %145 : vector<8x1xf32>
    %147 = math.rsqrt %146 : vector<8x1xf32>
    %148 = vector.broadcast %147 : vector<8x1xf32> to vector<8x128xf32>
    %149 = arith.mulf %144, %148 : vector<8x128xf32>
    %150 = vector.broadcast %128 : vector<1x128xf32> to vector<8x128xf32>
    %151 = arith.mulf %149, %150 : vector<8x128xf32>
    %152 = vector.broadcast %129 : vector<1x128xf32> to vector<8x128xf32>
    %153 = arith.addf %151, %152 : vector<8x128xf32>
    %c0_64 = arith.constant 0 : index
    %c0_65 = arith.constant 0 : index
    %154 = vector.load %arg18[%c0_64, %c0_65] : memref<1x128xf32, #tpu.memory_space<vmem>>, vector<1x128xf32>
    %155 = vector.broadcast %154 : vector<1x128xf32> to vector<8x128xf32>
    %156 = arith.mulf %153, %155 : vector<8x128xf32>
    %cst_66 = arith.constant dense<0.000000e+00> : vector<8xf32>
    %157 = vector.multi_reduction <add>, %156, %cst_66 [1] : vector<8x128xf32> to vector<8xf32>
    %158 = vector.shape_cast %157 : vector<8xf32> to vector<8x1xf32>
    %c0_67 = arith.constant 0 : index
    %c0_68 = arith.constant 0 : index
    %159 = vector.load %arg19[%c0_67, %c0_68] : memref<1x1xf32, #tpu.memory_space<vmem>>, vector<1x1xf32>
    %160 = vector.broadcast %159 : vector<1x1xf32> to vector<8x1xf32>
    %161 = arith.addf %158, %160 : vector<8x1xf32>
    %162 = tpu.iota {dimensions = array<i32: 1>} : vector<1x128xi32>
    %c64_i32 = arith.constant 64 : i32
    %163 = vector.broadcast %c64_i32 : i32 to vector<1x128xi32>
    %164 = arith.cmpi eq, %162, %163 : vector<1x128xi32>
    %165 = arith.extui %164 : vector<1x128xi1> to vector<1x128xi32>
    %166 = arith.sitofp %165 : vector<1x128xi32> to vector<1x128xf32>
    %cst_69 = arith.constant 1.000000e+00 : f32
    %167 = vector.broadcast %cst_69 : f32 to vector<1x128xf32>
    %168 = arith.subf %167, %166 : vector<1x128xf32>
    %169 = vector.broadcast %168 : vector<1x128xf32> to vector<8x128xf32>
    %170 = arith.mulf %127, %169 : vector<8x128xf32>
    %171 = vector.broadcast %161 : vector<8x1xf32> to vector<8x128xf32>
    %172 = vector.broadcast %166 : vector<1x128xf32> to vector<8x128xf32>
    %173 = arith.mulf %171, %172 : vector<8x128xf32>
    %174 = arith.addf %170, %173 : vector<8x128xf32>
    %c0_70 = arith.constant 0 : index
    %c0_71 = arith.constant 0 : index
    %175 = vector.load %arg20[%c0_70, %c0_71] : memref<8x128xf32, #tpu.memory_space<vmem>>, vector<8x128xf32>
    tpu.vector_store %arg20[%c0_70, %c0_71], %174 {strides = array<i32>} : memref<8x128xf32, #tpu.memory_space<vmem>>, vector<8x128xf32>,
    return
  }
  func.func @transform_0(%arg0: i32) -> (i32, i32) {
    %c0_i32 = arith.constant 0 : i32
    %c0_i32_0 = arith.constant 0 : i32
    return %arg0, %c0_i32 : i32, i32
  }
  func.func @transform_1(%arg0: i32) -> (i32, i32) {
    %c0_i32 = arith.constant 0 : i32
    %c0_i32_0 = arith.constant 0 : i32
    return %arg0, %c0_i32 : i32, i32
  }
  func.func @transform_2(%arg0: i32) -> (i32, i32) {
    %c0_i32 = arith.constant 0 : i32
    %c0_i32_0 = arith.constant 0 : i32
    return %arg0, %c0_i32 : i32, i32
  }
  func.func @transform_3(%arg0: i32) -> (i32, i32) {
    %c0_i32 = arith.constant 0 : i32
    %c0_i32_0 = arith.constant 0 : i32
    %c0_i32_1 = arith.constant 0 : i32
    return %c0_i32, %c0_i32_0 : i32, i32
  }
  func.func @transform_4(%arg0: i32) -> (i32, i32) {
    %c0_i32 = arith.constant 0 : i32
    %c0_i32_0 = arith.constant 0 : i32
    %c0_i32_1 = arith.constant 0 : i32
    return %c0_i32, %c0_i32_0 : i32, i32
  }
  func.func @transform_5(%arg0: i32) -> (i32, i32) {
    %c0_i32 = arith.constant 0 : i32
    %c0_i32_0 = arith.constant 0 : i32
    %c0_i32_1 = arith.constant 0 : i32
    return %c0_i32, %c0_i32_0 : i32, i32
  }
  func.func @transform_6(%arg0: i32) -> (i32, i32) {
    %c0_i32 = arith.constant 0 : i32
    %c0_i32_0 = arith.constant 0 : i32
    %c0_i32_1 = arith.constant 0 : i32
    return %c0_i32, %c0_i32_0 : i32, i32
  }
  func.func @transform_7(%arg0: i32) -> (i32, i32) {
    %c0_i32 = arith.constant 0 : i32
    %c0_i32_0 = arith.constant 0 : i32
    %c0_i32_1 = arith.constant 0 : i32
    return %c0_i32, %c0_i32_0 : i32, i32
  }
  func.func @transform_8(%arg0: i32) -> (i32, i32) {
    %c0_i32 = arith.constant 0 : i32
    %c0_i32_0 = arith.constant 0 : i32
    %c0_i32_1 = arith.constant 0 : i32
    return %c0_i32, %c0_i32_0 : i32, i32
  }
  func.func @transform_9(%arg0: i32) -> (i32, i32) {
    %c0_i32 = arith.constant 0 : i32
    %c0_i32_0 = arith.constant 0 : i32
    %c0_i32_1 = arith.constant 0 : i32
    return %c0_i32, %c0_i32_0 : i32, i32
  }
  func.func @transform_10(%arg0: i32) -> (i32, i32) {
    %c0_i32 = arith.constant 0 : i32
    %c0_i32_0 = arith.constant 0 : i32
    %c0_i32_1 = arith.constant 0 : i32
    return %c0_i32, %c0_i32_0 : i32, i32
  }
  func.func @transform_11(%arg0: i32) -> (i32, i32) {
    %c0_i32 = arith.constant 0 : i32
    %c0_i32_0 = arith.constant 0 : i32
    %c0_i32_1 = arith.constant 0 : i32
    return %c0_i32, %c0_i32_0 : i32, i32
  }
  func.func @transform_12(%arg0: i32) -> (i32, i32) {
    %c0_i32 = arith.constant 0 : i32
    %c0_i32_0 = arith.constant 0 : i32
    %c0_i32_1 = arith.constant 0 : i32
    return %c0_i32, %c0_i32_0 : i32, i32
  }
  func.func @transform_13(%arg0: i32) -> (i32, i32) {
    %c0_i32 = arith.constant 0 : i32
    %c0_i32_0 = arith.constant 0 : i32
    %c0_i32_1 = arith.constant 0 : i32
    return %c0_i32, %c0_i32_0 : i32, i32
  }
  func.func @transform_14(%arg0: i32) -> (i32, i32) {
    %c0_i32 = arith.constant 0 : i32
    %c0_i32_0 = arith.constant 0 : i32
    %c0_i32_1 = arith.constant 0 : i32
    return %c0_i32, %c0_i32_0 : i32, i32
  }
  func.func @transform_15(%arg0: i32) -> (i32, i32) {
    %c0_i32 = arith.constant 0 : i32
    %c0_i32_0 = arith.constant 0 : i32
    %c0_i32_1 = arith.constant 0 : i32
    return %c0_i32, %c0_i32_0 : i32, i32
  }
  func.func @transform_16(%arg0: i32) -> (i32, i32) {
    %c0_i32 = arith.constant 0 : i32
    %c0_i32_0 = arith.constant 0 : i32
    %c0_i32_1 = arith.constant 0 : i32
    return %c0_i32, %c0_i32_0 : i32, i32
  }
  func.func @transform_17(%arg0: i32) -> (i32, i32) {
    %c0_i32 = arith.constant 0 : i32
    %c0_i32_0 = arith.constant 0 : i32
    %c0_i32_1 = arith.constant 0 : i32
    return %c0_i32, %c0_i32_0 : i32, i32
  }
  func.func @transform_18(%arg0: i32) -> (i32, i32) {
    %c0_i32 = arith.constant 0 : i32
    %c0_i32_0 = arith.constant 0 : i32
    %c0_i32_1 = arith.constant 0 : i32
    return %c0_i32, %c0_i32_0 : i32, i32
  }
  func.func @transform_19(%arg0: i32) -> (i32, i32) {
    %c0_i32 = arith.constant 0 : i32
    %c0_i32_0 = arith.constant 0 : i32
    return %arg0, %c0_i32 : i32, i32
  }
}

</mosaic_0001>

<bundles_post_ra>
// kernel: tpu_custom_call.1
= control target key start
LH: loop header
LB: loop body
LE: loop exit
PB: predicated region body
PF: predicated region fallthrough
CT: control target
= control target key end

     0   :  { %s1605_s0 = inlined_call_operand.vmem [shape: f32[8,64], index: 0, kind: input, shape index: {}]   ;;  %s1606_s1 = inlined_call_operand.vmem [shape: f32[8,128], index: 1, kind: input, shape index: {}]   ;;  %s1607_s2 = inlined_call_operand.vmem [shape: f32[8,1], index: 2, kind: input, shape index: {}]   ;;  %s1608_s3 = inlined_call_operand.vmem [shape: f32[1,64], index: 3, kind: input, shape index: {}]   ;;  %s1609_s4 = inlined_call_operand.vmem [shape: f32[1,64], index: 4, kind: input, shape index: {}]   ;;  %s1610_s5 = inlined_call_operand.hbm [shape: bf16[64,128], index: 5, kind: input, shape index: {}]   ;;  %s1611_s6 = inlined_call_operand.vmem [shape: f32[1,128], index: 6, kind: input, shape index: {}]   ;;  %s1612_s7 = inlined_call_operand.vmem [shape: f32[1,128], index: 7, kind: input, shape index: {}]   ;;  %s1613_s8 = inlined_call_operand.vmem [shape: f32[1,128], index: 8, kind: input, shape index: {}]   ;;  %s1614_s9 = inlined_call_operand.hbm [shape: bf16[128,128], index: 9, kind: input, shape index: {}]   ;;  %s1615_s10 = inlined_call_operand.vmem [shape: f32[1,128], index: 10, kind: input, shape index: {}]   ;;  %s1616_s11 = inlined_call_operand.vmem [shape: f32[1,128], index: 11, kind: input, shape index: {}]   ;;  %s1617_s12 = inlined_call_operand.vmem [shape: f32[1,128], index: 12, kind: input, shape index: {}]   ;;  %s1618_s13 = inlined_call_operand.hbm [shape: bf16[256,512], index: 13, kind: input, shape index: {}]   ;;  %s1619_s14 = inlined_call_operand.vmem [shape: f32[1,512], index: 14, kind: input, shape index: {}]   ;;  %s1620_s15 = inlined_call_operand.vmem [shape: f32[1,128], index: 15, kind: input, shape index: {}]   ;;  %s1621_s16 = inlined_call_operand.vmem [shape: f32[1,128], index: 16, kind: input, shape index: {}]   ;;  %s1622_s17 = inlined_call_operand.vmem [shape: f32[1,128], index: 17, kind: input, shape index: {}]   ;;  %s1623_s18 = inlined_call_operand.<no memory space> [shape: f32[1,1], index: 18, kind: input, shape index: {}]   ;;  %s1624_s19 = inlined_call_operand.hbm [shape: f32[8,128], index: 19, kind: output, shape index: {}]  }
   0x1   :  { %1625 = sst [smem:[#allocation13_spill]] %s1605_s0  ;;  %v24_v0 = vstv %s1623_s18 }
   0x2   :  { %1626 = sst [smem:[#allocation14_spill]] %s1606_s1  ;;  %25 = vst [vmem:[#allocation2] sm:$0x1] %v24_v0 }
   0x3   :  { %1627 = sst [smem:[#allocation15_spill]] %s1607_s2 }
   0x4   :  { %1628 = sst [smem:[#allocation16_spill]] %s1608_s3 }
   0x5   :  { %26 = vsyncpa [#allocation4], 0 }
   0x6   :  { %27 = vsyncpa [#allocation7], 0 }
   0x7   :  { %28 = vsyncpa [#allocation5], 0  ;;  %s1365_s20 = smov [#allocation6]   ;;  %s1366_s1 = smov [#allocation3]  }
   0x8   :  { %s62_s21 = sshll.u32 %s1365_s20, 4  ;;  %s44_s22 = sshll.u32 %s1366_s1, 4  ;;  %s63_s21 = int_to_ptr.vmem [resolvable:$true] %s62_s21  ;;  %s1479_s22 = int_to_ptr.vmem [resolvable:$true] %s44_s22 }
   0x9   :  { %s1271_s24 = scalar_lea.hbm %s1614_s9, 1024 }
   0xa   :  { %p1272_p0 = scmp.ne.s32.totalorder %s1614_s9, %s1271_s24  ;;  %p1275_p1 = scmp.lt.u32.totalorder %s1271_s24, %s1614_s9 }
   0xc   :  { %p1277_p2 = pnand %p1275_p1, %p1272_p0 }
   0xe   :  { %1280 = shalt.err (!%p1277_p2)
}
   0xf   :  { %s1281_s27 = scalar_lea.vmem %s63_s21, 1024  ;;  %p1286_p4 = scmp.lt.s32.totalorder %s63_s21, %s63_s21 }
  0x10   :  { %p1282_p3 = scmp.ne.s32.totalorder %s63_s21, %s1281_s27  ;;  %p1287_p5 = scmp.lt.s32.totalorder %s1281_s27, %s1281_s27 }
  0x12   :  { %p1288_p6 = por %p1287_p5, %p1286_p4 }
  0x14   :  { %p1289_p7 = pnand %p1288_p6, %p1282_p3 }
  0x16   :  { %1292 = shalt.err (!%p1289_p7)
}
  0x17   :  { %s1367_s28 = smov 64   ;;  %s1368_s29 = smov 4  }
  0x18   :  { %68 = dma.hbm_to_vmem [thread:$0]  %s1614_s9, 1024, %s63_s21, [#allocation7], %s1367_s28, %s1367_s28, %s1368_s29  }
  0x19   :  { %s1293_s2 = scalar_lea.hbm %s1610_s5, 512 }
  0x1a   :  { %p1294_p8 = scmp.ne.s32.totalorder %s1610_s5, %s1293_s2  ;;  %p1297_p9 = scmp.lt.u32.totalorder %s1293_s2, %s1610_s5 }
  0x1c   :  { %p1299_p10 = pnand %p1297_p9, %p1294_p8 }
  0x1e   :  { %1302 = shalt.err (!%p1299_p10)
}
  0x1f   :  { %s1303_s18 = scalar_lea.vmem %s1479_s22, 512  ;;  %p1308_p12 = scmp.lt.s32.totalorder %s1479_s22, %s1479_s22 }
  0x20   :  { %p1304_p11 = scmp.ne.s32.totalorder %s1479_s22, %s1303_s18  ;;  %p1309_p13 = scmp.lt.s32.totalorder %s1303_s18, %s1303_s18 }
  0x22   :  { %p1310_p0 = por %p1309_p13, %p1308_p12 }
  0x24   :  { %p1311_p1 = pnand %p1310_p0, %p1304_p11 }
  0x26   :  { %1314 = shalt.err (!%p1311_p1)
}
  0x27   :  { %50 = dma.hbm_to_vmem [thread:$0]  %s1610_s5, 512, %s1479_s22, [#allocation4], %s1367_s28, %s1367_s28, %s1368_s29  }
  0x28   :  { %s1369_s26 = smov [#allocation8]   ;;  %s1315_s20 = scalar_lea.hbm %s1618_s13, 8192 }
  0x29   :  { %s80_s27 = sshll.u32 %s1369_s26, 4  ;;  %p1316_p2 = scmp.ne.s32.totalorder %s1618_s13, %s1315_s20  ;;  %s81_s27 = int_to_ptr.vmem [resolvable:$true] %s80_s27 }
  0x2a   :  { %p1319_p3 = scmp.lt.u32.totalorder %s1315_s20, %s1618_s13 }
  0x2c   :  { %p1321_p4 = pnand %p1319_p3, %p1316_p2 }
  0x2e   :  { %1324 = shalt.err (!%p1321_p4)
}
  0x2f   :  { %s1325_s25 = scalar_lea.vmem %s81_s27, 8192  ;;  %p1330_p6 = scmp.lt.s32.totalorder %s81_s27, %s81_s27 }
  0x30   :  { %p1326_p5 = scmp.ne.s32.totalorder %s81_s27, %s1325_s25  ;;  %p1331_p7 = scmp.lt.s32.totalorder %s1325_s25, %s1325_s25 }
  0x32   :  { %p1332_p8 = por %p1331_p7, %p1330_p6 }
  0x34   :  { %p1333_p9 = pnand %p1332_p8, %p1326_p5 }
  0x36   :  { %1336 = shalt.err (!%p1333_p9)
}
  0x37   :  { %s1370_s5 = smov 256   ;;  %s1371_s22 = smov 16  }
  0x38   :  { %86 = dma.hbm_to_vmem [thread:$0]  %s1618_s13, 8192, %s81_s27, [#allocation7], %s1370_s5, %s1370_s5, %s1371_s22  }
  0x39   :  { %1359 = dma.done.wait [#allocation4], 512  }
  0x3a   :  { %1360 = vsyncadd [#allocation4], 4294966784 }
  0x3b   :  { %1361 = dma.done.wait [#allocation7], 9216  }
  0x3c   :  { %1362 = vsyncadd [#allocation7], 4294958080  ;;  %vm110_vm0 = vcmask 523264   ;;  %s1629_s9 = sld [smem:[#allocation13_spill]]  ;;  %v1145_v5 = vld [vmem:[#allocation3] sm:$0xff]   ;;  %v1372_v6 = vmov 0.0  }
  0x3d   :  { %1100 = vmatprep.subr.bf16.mxu0 %v1372_v6  ;;  %v1146_v7 = vld [vmem:[#allocation3 + $0x8] sm:$0xff]   ;;  %vm1373_vm1 = vmmov 0   ;;  %1112 = vmatprep.subr.bf16.mxu1 %v1372_v6  ;;  %v1147_v8 = vld [vmem:[#allocation3 + $0x10] sm:$0xff]   ;;  %v1148_v9 = vld [vmem:[#allocation3 + $0x18] sm:$0xff]   ;;  %s1630_s26 = sld [smem:[#allocation16_spill]]  ;;  %v1374_v58 = vmov 0  }
  0x3e   :  { %1108 = vmatprep.mubr.msk.bf16.mxu0 %vm1373_vm1, %v1372_v6  ;;  %1101 = vmatpush3.bf16.msra.mxu0 %v1145_v5  ;;  %v995_v22 = vld [vmem:[%s1609_s4] ss:$0 sm:$0xff]  ;;  %v1149_v34 = vld [vmem:[#allocation6] sm:$0xff]   ;;  %v1150_v35 = vld [vmem:[#allocation6 + $0x8] sm:$0xff]   ;;  %s1631_s24 = sld [smem:[#allocation15_spill]]  ;;  %s1632_s22 = sld [smem:[#allocation14_spill]] }
  0x3f   :  { %1102 = vmatprep.subr.bf16.mxu0 %v1372_v6  ;;  %1128 = vmatprep.mubr.msk.bf16.mxu1 %vm1373_vm1, %v1372_v6  ;;  %v996_v26 = vld [vmem:[%s1611_s6] ss:$0 sm:$0xff]  ;;  %v1151_v36 = vld [vmem:[#allocation6 + $0x10] sm:$0xff]   ;;  %v1153_v38 = vld [vmem:[#allocation6 + $0x20] sm:$0xff]  }
  0x40   :  { %1113 = vmatpush3.bf16.msra.mxu1 %v1149_v34  ;;  %v1152_v37 = vld [vmem:[#allocation6 + $0x18] sm:$0xff]   ;;  %v1154_v39 = vld [vmem:[#allocation6 + $0x28] sm:$0xff]   ;;  %v1155_v40 = vld [vmem:[#allocation6 + $0x30] sm:$0xff]   ;;  %1143 = vset.pattern.permute.xlu0 %v1374_v58 }
  0x41   :  { %1114 = vmatprep.subr.bf16.mxu1 %v1372_v6  ;;  %v1156_v41 = vld [vmem:[#allocation6 + $0x38] sm:$0xff]   ;;  %1144 = vset.pattern.permute.xlu1 %v1374_v58  ;;  %v1157_v59 = vld [vmem:[#allocation8] ss:$16 sps:$4 sm:$0xff]   ;;  %v1159_v60 = vld [vmem:[#allocation8 + $0x4] ss:$16 sps:$4 sm:$0xff]  }
  0x42   :  { %v107_v1 = vld [vmem:[%s1629_s9] sm:$0xff]  ;;  %1103 = vmatpush3.bf16.msra.mxu0 %v1146_v7  ;;  %v1160_v61 = vld [vmem:[#allocation8 + $0x8] ss:$16 sps:$4 sm:$0xff]  }
  0x43   :  { %v111_v2 = vsel %vm110_vm0, %v107_v1, 0.0  ;;  %v114_v3 = vmul.f32 %v107_v1, %v107_v1  ;;  %1104 = vmatprep.subr.bf16.mxu0 %v1372_v6  ;;  %v994_v20 = vld [vmem:[%s1630_s26] ss:$0 sm:$0xff]  ;;  %v1165_v63 = vld [vmem:[#allocation8 + $0x24] ss:$16 sps:$4 sm:$0xff]  }
  0x44   :  { %112 = vadd.xlane.f32.xlu0 %v111_v2  ;;  %1115 = vmatpush3.bf16.msra.mxu1 %v1150_v35  ;;  %v1002_v52 = vld [vmem:[%s1612_s7] ss:$0 sm:$0xff]  ;;  %v1166_v2 = vld [vmem:[#allocation8 + $0x28] ss:$16 sps:$4 sm:$0xff]   ;;  %v1169_v5 = vld [vmem:[#allocation8 + $0x40] ss:$16 sps:$4 sm:$0xff]  }
  0x45   :  { %v115_v4 = vsel %vm110_vm0, %v114_v3, 0.0  ;;  %1116 = vmatprep.subr.bf16.mxu1 %v1372_v6  ;;  %v1003_v54 = vld [vmem:[%s1613_s8] ss:$0 sm:$0xff]  ;;  %v1171_v3 = vld [vmem:[#allocation8 + $0x44] ss:$16 sps:$4 sm:$0xff]  }
  0x46   :  { %1105 = vmatpush3.bf16.msra.mxu0 %v1147_v8  ;;  %v1162_v62 = vld [vmem:[#allocation8 + $0xc] ss:$16 sps:$4 sm:$0xff]   ;;  %v1172_v7 = vld [vmem:[#allocation8 + $0x48] ss:$16 sps:$4 sm:$0xff]   ;;  %v1177_v8 = vld [vmem:[#allocation8 + $0x64] ss:$16 sps:$4 sm:$0xff]  }
  0x47   :  { %1106 = vmatprep.subr.bf16.mxu0 %v1372_v6  ;;  %v1168_v0 = vld [vmem:[#allocation8 + $0x2c] ss:$16 sps:$4 sm:$0xff]  }
  0x48   :  { %116 = vadd.xlane.f32.xlu0 %v115_v4  ;;  %1117 = vmatpush3.bf16.msra.mxu1 %v1151_v36  ;;  %v1174_v4 = vld [vmem:[#allocation8 + $0x4c] ss:$16 sps:$4 sm:$0xff]  }
  0x49   :  { %1118 = vmatprep.subr.bf16.mxu1 %v1372_v6  ;;  %v1240_v58 = vld [vmem:[#allocation8 + $0x1ac] ss:$16 sps:$4 sm:$0xff]  }
  0x4a   :  { %1107 = vmatpush3.bf16.msra.mxu0 %v1148_v9  ;;  %v1180_v9 = vld [vmem:[#allocation8 + $0x6c] ss:$16 sps:$4 sm:$0xff]  }
  0x4b   :  { %814 = vmatprep.subr.bf16.mxu0 %v1159_v60  ;;  %v1238_v60 = vld [vmem:[#allocation8 + $0x1a8] ss:$16 sps:$4 sm:$0xff]  }
  0x4c   :  { %1119 = vmatpush3.bf16.msra.mxu1 %v1152_v37 }
  0x4d   :  { %1120 = vmatprep.subr.bf16.mxu1 %v1372_v6 }
  0x50   :  { %1121 = vmatpush3.bf16.msra.mxu1 %v1153_v38 }
  0x51   :  { %1122 = vmatprep.subr.bf16.mxu1 %v1372_v6 }
  0x54   :  { %1123 = vmatpush3.bf16.msra.mxu1 %v1154_v39 }
  0x55   :  { %1124 = vmatprep.subr.bf16.mxu1 %v1372_v6 }
  0x58   :  { %1125 = vmatpush3.bf16.msra.mxu1 %v1155_v40  ;;  %v1213_v40 = vld [vmem:[#allocation8 + $0x124] ss:$16 sps:$4 sm:$0xff]  }
  0x59   :  { %1126 = vmatprep.subr.bf16.mxu1 %v1372_v6 }
  0x5c   :  { %1127 = vmatpush3.bf16.msra.mxu1 %v1156_v41  ;;  %v1216_v41 = vld [vmem:[#allocation8 + $0x12c] ss:$16 sps:$4 sm:$0xff]  }
  0x5d   :  { %855 = vmatprep.subr.bf16.mxu1 %v1162_v62  ;;  %v1246_v62 = vld [vmem:[#allocation8 + $0x1cc] ss:$16 sps:$4 sm:$0xff]  }
  0xd1   :  { %v113_v10 = vpop.xlane.xlu0 %112 }
  0xd2   :  { %v118_v11 = vmul.f32 0.015625, %v113_v10  ;;  %v1175_v10 = vld [vmem:[#allocation8 + $0x60] ss:$16 sps:$4 sm:$0xff]  }
  0xd4   :  { %v120_v13 = vmul.f32 %v118_v11, %v118_v11  ;;  %v123_v18 = vsub.f32 %v107_v1, %v118_v11  ;;  %v1163_v1 = vld [vmem:[#allocation8 + $0x20] ss:$16 sps:$4 sm:$0xff]   ;;  %v1178_v11 = vld [vmem:[#allocation8 + $0x68] ss:$16 sps:$4 sm:$0xff]  }
  0xd5   :  { %v117_v12 = vpop.xlane.xlu0 %116 }
  0xd6   :  { %v119_v14 = vmul.f32 0.015625, %v117_v12  ;;  %v1183_v12 = vld [vmem:[#allocation8 + $0x84] ss:$16 sps:$4 sm:$0xff]  }
  0xd8   :  { %v121_v15 = vsub.f32 %v119_v14, %v120_v13  ;;  %v1186_v13 = vld [vmem:[#allocation8 + $0x8c] ss:$16 sps:$4 sm:$0xff]   ;;  %v1181_v14 = vld [vmem:[#allocation8 + $0x80] ss:$16 sps:$4 sm:$0xff]  }
  0xda   :  { %v122_v16 = vmax.f32 %v121_v15, 0.0  ;;  %v1184_v15 = vld [vmem:[#allocation8 + $0x88] ss:$16 sps:$4 sm:$0xff]  }
  0xdc   :  { %v124_v17 = vadd.f32 1e-05, %v122_v16  ;;  %v1189_v16 = vld [vmem:[#allocation8 + $0xa4] ss:$16 sps:$4 sm:$0xff]  }
  0xde   :  { %1253 = vrsqrt.f32 %v124_v17  ;;  %v1192_v17 = vld [vmem:[#allocation8 + $0xac] ss:$16 sps:$4 sm:$0xff]  }
  0xe8   :  { %v1254_v19 = vpop.eup %1253 }
  0xe9   :  { %v126_v21 = vmul.f32 %v1254_v19, %v123_v18  ;;  %v1187_v18 = vld [vmem:[#allocation8 + $0xa0] ss:$16 sps:$4 sm:$0xff]   ;;  %v1190_v19 = vld [vmem:[#allocation8 + $0xa8] ss:$16 sps:$4 sm:$0xff]  }
  0xeb   :  { %v133_v23 = vmul.f32 %v994_v20, %v126_v21  ;;  %v1195_v20 = vld [vmem:[#allocation8 + $0xc4] ss:$16 sps:$4 sm:$0xff]   ;;  %v1198_v21 = vld [vmem:[#allocation8 + $0xcc] ss:$16 sps:$4 sm:$0xff]  }
  0xed   :  { %v140_v24 = vadd.f32 %v995_v22, %v133_v23  ;;  %v1193_v22 = vld [vmem:[#allocation8 + $0xc0] ss:$16 sps:$4 sm:$0xff]   ;;  %v1196_v23 = vld [vmem:[#allocation8 + $0xc8] ss:$16 sps:$4 sm:$0xff]  }
  0xef   :  { %v141_v25 = vpack.c.bf16 %v140_v24, %v140_v24  ;;  %v1201_v24 = vld [vmem:[#allocation8 + $0xe4] ss:$16 sps:$4 sm:$0xff]  }
  0xf1   :  { %1109 = vmatmul.mubr.msk.bf16.vlgmr.msra.gmra.mrb[0].mxu0 %vm110_vm0, %v141_v25  ;;  %v1204_v25 = vld [vmem:[#allocation8 + $0xec] ss:$16 sps:$4 sm:$0xff]  }
  0xf2   :  { %815 = vmatpush1.bf16.msra.mxu0 %v1157_v59  ;;  %v1235_v59 = vld [vmem:[#allocation8 + $0x1a0] ss:$16 sps:$4 sm:$0xff]  }
  0xf3   :  { %816 = vmatprep.subr.bf16.mxu0 %v1165_v63  ;;  %v1241_v63 = vld [vmem:[#allocation8 + $0x1c0] ss:$16 sps:$4 sm:$0xff]  }
  0xf6   :  { %817 = vmatpush1.bf16.msra.mxu0 %v1163_v1  ;;  %v1249_v1 = vld [vmem:[#allocation8 + $0x1e4] ss:$16 sps:$4 sm:$0xff]  }
  0xf7   :  { %818 = vmatprep.subr.bf16.mxu0 %v1171_v3  ;;  %v1247_v3 = vld [vmem:[#allocation8 + $0x1e0] ss:$16 sps:$4 sm:$0xff]  }
  0xfa   :  { %819 = vmatpush1.bf16.msra.mxu0 %v1169_v5 }
  0xfb   :  { %820 = vmatprep.subr.bf16.mxu0 %v1177_v8 }
  0xfe   :  { %821 = vmatpush1.bf16.msra.mxu0 %v1175_v10 }
  0xff   :  { %822 = vmatprep.subr.bf16.mxu0 %v1183_v12  ;;  %v398_v12 = vld [vmem:[%s1632_s22] sm:$0xff] }
 0x102   :  { %823 = vmatpush1.bf16.msra.mxu0 %v1181_v14 }
 0x103   :  { %824 = vmatprep.subr.bf16.mxu0 %v1189_v16 }
 0x106   :  { %825 = vmatpush1.bf16.msra.mxu0 %v1187_v18 }
 0x107   :  { %826 = vmatprep.subr.bf16.mxu0 %v1195_v20  ;;  %v1013_v20 = vld [vmem:[%s1616_s11] ss:$0 sm:$0xff] }
 0x10a   :  { %827 = vmatpush1.bf16.msra.mxu0 %v1193_v22  ;;  %v1014_v22 = vld [vmem:[%s1617_s12] ss:$0 sm:$0xff] }
 0x10b   :  { %828 = vmatprep.subr.bf16.mxu0 %v1201_v24 }
 0x1c4   :  { %v218_v27 = vpop.f32.mrb[0].mxu0 }
 0x1c5   :  { %v219_v28 = vadd.f32 %v996_v26, %v218_v27  ;;  %v1110_v29 = vpop.f32.mrb[1].mxu0  ;;  %v1199_v26 = vld [vmem:[#allocation8 + $0xe0] ss:$16 sps:$4 sm:$0xff]   ;;  %v1202_v27 = vld [vmem:[#allocation8 + $0xe8] ss:$16 sps:$4 sm:$0xff]  }
 0x1c6   :  { %v221_v30 = vpop.f32.mrb[2].mxu0  ;;  %v1210_v29 = vld [vmem:[#allocation8 + $0x10c] ss:$16 sps:$4 sm:$0xff]   ;;  %829 = vmatpush1.bf16.msra.mxu0 %v1199_v26  ;;  %v474_v26 = vlaneseq }
 0x1c7   :  { %v224_v31 = vmax.f32 %v219_v28, 0.0  ;;  %v1111_v32 = vpop.f32.mrb[3].mxu0  ;;  %v1207_v28 = vld [vmem:[#allocation8 + $0x104] ss:$16 sps:$4 sm:$0xff]   ;;  %v1205_v30 = vld [vmem:[#allocation8 + $0x100] ss:$16 sps:$4 sm:$0xff]  }
 0x1c8   :  { %830 = vmatprep.subr.bf16.mxu0 %v1207_v28  ;;  %v1004_v32 = vld [vmem:[%s1615_s10] ss:$0 sm:$0xff] }
 0x1c9   :  { %227 = vadd.xlane.f32.xlu1 %v224_v31  ;;  %v229_v33 = vmul.f32 %v224_v31, %v224_v31 }
 0x1ca   :  { %831 = vmatpush1.bf16.msra.mxu0 %v1205_v30 }
 0x1cb   :  { %832 = vmatprep.subr.bf16.mxu0 %v1213_v40 }
 0x1cd   :  { %230 = vadd.xlane.f32.xlu1 %v229_v33 }
 0x256   :  { %v228_v42 = vpop.xlane.xlu1 %227 }
 0x257   :  { %v232_v43 = vmul.f32 0.015625, %v228_v42  ;;  %v1211_v42 = vld [vmem:[#allocation8 + $0x120] ss:$16 sps:$4 sm:$0xff]  }
 0x258   :  { %833 = vmatpush1.bf16.msra.mxu0 %v1211_v42 }
 0x259   :  { %v234_v45 = vmul.f32 %v232_v43, %v232_v43  ;;  %v237_v50 = vsub.f32 %v224_v31, %v232_v43  ;;  %v1208_v31 = vld [vmem:[#allocation8 + $0x108] ss:$16 sps:$4 sm:$0xff]  }
 0x25a   :  { %v231_v44 = vpop.xlane.xlu1 %230  ;;  %v1214_v43 = vld [vmem:[#allocation8 + $0x128] ss:$16 sps:$4 sm:$0xff]  }
 0x25b   :  { %v233_v46 = vmul.f32 0.015625, %v231_v44  ;;  %v1219_v44 = vld [vmem:[#allocation8 + $0x144] ss:$16 sps:$4 sm:$0xff]  }
 0x25c   :  { %834 = vmatprep.subr.bf16.mxu0 %v1219_v44 }
 0x25d   :  { %v235_v47 = vsub.f32 %v233_v46, %v234_v45  ;;  %v1222_v45 = vld [vmem:[#allocation8 + $0x14c] ss:$16 sps:$4 sm:$0xff]   ;;  %v1217_v46 = vld [vmem:[#allocation8 + $0x140] ss:$16 sps:$4 sm:$0xff]  }
 0x25e   :  { %835 = vmatpush1.bf16.msra.mxu0 %v1217_v46 }
 0x25f   :  { %v236_v48 = vmax.f32 %v235_v47, 0.0  ;;  %v1220_v47 = vld [vmem:[#allocation8 + $0x148] ss:$16 sps:$4 sm:$0xff]  }
 0x261   :  { %v238_v49 = vadd.f32 1e-05, %v236_v48  ;;  %v399_v48 = vld [vmem:[%s1631_s24] sm:$0xff] }
 0x263   :  { %1255 = vrsqrt.f32 %v238_v49  ;;  %v1225_v49 = vld [vmem:[#allocation8 + $0x164] ss:$16 sps:$4 sm:$0xff]  }
 0x264   :  { %836 = vmatprep.subr.bf16.mxu0 %v1225_v49 }
 0x26d   :  { %v1256_v51 = vpop.eup %1255 }
 0x26e   :  { %v240_v53 = vmul.f32 %v1256_v51, %v237_v50  ;;  %v1228_v50 = vld [vmem:[#allocation8 + $0x16c] ss:$16 sps:$4 sm:$0xff]   ;;  %v1223_v51 = vld [vmem:[#allocation8 + $0x160] ss:$16 sps:$4 sm:$0xff]  }
 0x26f   :  { %837 = vmatpush1.bf16.msra.mxu0 %v1223_v51 }
 0x270   :  { %v247_v55 = vmul.f32 %v1002_v52, %v240_v53  ;;  %v1226_v52 = vld [vmem:[#allocation8 + $0x168] ss:$16 sps:$4 sm:$0xff]   ;;  %v1229_v53 = vld [vmem:[#allocation8 + $0x180] ss:$16 sps:$4 sm:$0xff]  }
 0x272   :  { %v254_v56 = vadd.f32 %v1003_v54, %v247_v55  ;;  %v1231_v54 = vld [vmem:[#allocation8 + $0x184] ss:$16 sps:$4 sm:$0xff]   ;;  %v1232_v55 = vld [vmem:[#allocation8 + $0x188] ss:$16 sps:$4 sm:$0xff]  }
 0x273   :  { %838 = vmatprep.subr.bf16.mxu0 %v1231_v54 }
 0x274   :  { %v255_v57 = vpack.c.bf16 %v254_v56, %v254_v56  ;;  %v1234_v56 = vld [vmem:[#allocation8 + $0x18c] ss:$16 sps:$4 sm:$0xff]   ;;  %839 = vmatpush1.bf16.msra.mxu0 %v1229_v53 }
 0x276   :  { %1129 = vmatmul.mubr.bf16.vlgmr.msra.gmra.mrb[0].mxu1 %v255_v57  ;;  %v1237_v57 = vld [vmem:[#allocation8 + $0x1a4] ss:$16 sps:$4 sm:$0xff]  }
 0x277   :  { %856 = vmatpush1.bf16.msra.mxu1 %v1160_v61  ;;  %840 = vmatprep.subr.bf16.mxu0 %v1237_v57  ;;  %v1243_v61 = vld [vmem:[#allocation8 + $0x1c4] ss:$16 sps:$4 sm:$0xff]  }
 0x278   :  { %857 = vmatprep.subr.bf16.mxu1 %v1168_v0  ;;  %841 = vmatpush1.bf16.msra.mxu0 %v1235_v59  ;;  %v1244_v0 = vld [vmem:[#allocation8 + $0x1c8] ss:$16 sps:$4 sm:$0xff]  }
 0x279   :  { %842 = vmatprep.subr.bf16.mxu0 %v1243_v61 }
 0x27b   :  { %858 = vmatpush1.bf16.msra.mxu1 %v1166_v2  ;;  %v1252_v2 = vld [vmem:[#allocation8 + $0x1ec] ss:$16 sps:$4 sm:$0xff]  }
 0x27c   :  { %859 = vmatprep.subr.bf16.mxu1 %v1174_v4  ;;  %843 = vmatpush1.bf16.msra.mxu0 %v1241_v63  ;;  %v1250_v4 = vld [vmem:[#allocation8 + $0x1e8] ss:$16 sps:$4 sm:$0xff]  }
 0x27d   :  { %844 = vmatprep.subr.bf16.mxu0 %v1249_v1 }
 0x27f   :  { %860 = vmatpush1.bf16.msra.mxu1 %v1172_v7 }
 0x280   :  { %861 = vmatprep.subr.bf16.mxu1 %v1180_v9  ;;  %845 = vmatpush1.bf16.msra.mxu0 %v1247_v3 }
 0x283   :  { %862 = vmatpush1.bf16.msra.mxu1 %v1178_v11 }
 0x284   :  { %863 = vmatprep.subr.bf16.mxu1 %v1186_v13 }
 0x287   :  { %864 = vmatpush1.bf16.msra.mxu1 %v1184_v15 }
 0x288   :  { %865 = vmatprep.subr.bf16.mxu1 %v1192_v17 }
 0x28b   :  { %866 = vmatpush1.bf16.msra.mxu1 %v1190_v19 }
 0x28c   :  { %867 = vmatprep.subr.bf16.mxu1 %v1198_v21 }
 0x28f   :  { %868 = vmatpush1.bf16.msra.mxu1 %v1196_v23 }
 0x290   :  { %869 = vmatprep.subr.bf16.mxu1 %v1204_v25 }
 0x293   :  { %870 = vmatpush1.bf16.msra.mxu1 %v1202_v27  ;;  %v475_v27 = vshrl.u32 %v474_v26, 7 }
 0x294   :  { %871 = vmatprep.subr.bf16.mxu1 %v1210_v29  ;;  %v472_v29 = vld [vmem:[%s1619_s14] sm:$0xf] }
 0x295   :  { %v476_v28 = vsub.s32 0, %v475_v27  ;;  %v480_v30 = vsub.s32 1, %v475_v27 }
 0x297   :  { %872 = vmatpush1.bf16.msra.mxu1 %v1208_v31  ;;  %v477_v31 = vrot.slane %v472_v29, %v476_v28 }
 0x298   :  { %873 = vmatprep.subr.bf16.mxu1 %v1216_v41 }
 0x29b   :  { %874 = vmatpush1.bf16.msra.mxu1 %v1214_v43 }
 0x29c   :  { %875 = vmatprep.subr.bf16.mxu1 %v1222_v45 }
 0x29f   :  { %876 = vmatpush1.bf16.msra.mxu1 %v1220_v47  ;;  %v488_v47 = vsub.s32 3, %v475_v27 }
 0x2a0   :  { %877 = vmatprep.subr.bf16.mxu1 %v1228_v50 }
 0x2a1   :  { %v489_v50 = vrot.slane %v472_v29, %v488_v47 }
 0x2a3   :  { %878 = vmatpush1.bf16.msra.mxu1 %v1226_v52 }
 0x2a4   :  { %879 = vmatprep.subr.bf16.mxu1 %v1234_v56 }
 0x2a7   :  { %880 = vmatpush1.bf16.msra.mxu1 %v1232_v55 }
 0x2a8   :  { %881 = vmatprep.subr.bf16.mxu1 %v1240_v58 }
 0x2ab   :  { %882 = vmatpush1.bf16.msra.mxu1 %v1238_v60 }
 0x2ac   :  { %883 = vmatprep.subr.bf16.mxu1 %v1246_v62 }
 0x2af   :  { %884 = vmatpush1.bf16.msra.mxu1 %v1244_v0 }
 0x2b0   :  { %885 = vmatprep.subr.bf16.mxu1 %v1252_v2 }
 0x2b3   :  { %886 = vmatpush1.bf16.msra.mxu1 %v1250_v4 }
 0x349   :  { %v361_v33 = vpop.f32.mrb[0].mxu1 }
 0x34a   :  { %v362_v34 = vadd.f32 %v1004_v32, %v361_v33  ;;  %v1130_v35 = vpop.f32.mrb[1].mxu1 }
 0x34b   :  { %v364_v36 = vpop.f32.mrb[2].mxu1 }
 0x34c   :  { %v1560_v37 = vmax.f32 %v362_v34, 0.0  ;;  %v1131_v38 = vpop.f32.mrb[3].mxu1  ;;  %v481_v34 = vrot.slane %v472_v29, %v480_v30 }
 0x34e   :  { %370 = vadd.xlane.f32.xlu0 %v1560_v37  ;;  %v372_v39 = vmul.f32 %v1560_v37, %v1560_v37 }
 0x350   :  { %373 = vadd.xlane.f32.xlu1 %v372_v39 }
 0x364   :  { %402 = vperm.xlu0 %1143, %v399_v48   ;;  %v484_v48 = vsub.s32 2, %v475_v27 }
 0x366   :  { %v485_v51 = vrot.slane %v472_v29, %v484_v48 }
 0x3db   :  { %v371_v5 = vpop.xlane.xlu0 %370 }
 0x3dc   :  { %v375_v7 = vmul.f32 0.015625, %v371_v5 }
 0x3dd   :  { %v374_v8 = vpop.xlane.xlu1 %373 }
 0x3de   :  { %v377_v9 = vmul.f32 %v375_v7, %v375_v7  ;;  %v376_v10 = vmul.f32 0.015625, %v374_v8  ;;  %v380_v18 = vsub.f32 %v1560_v37, %v375_v7 }
 0x3e0   :  { %v378_v11 = vsub.f32 %v376_v10, %v377_v9 }
 0x3e2   :  { %v379_v13 = vmax.f32 %v378_v11, 0.0 }
 0x3e3   :  { %v403_v14 = vpop.permute.xlu0 %402 }
 0x3e4   :  { %v381_v15 = vadd.f32 1e-05, %v379_v13  ;;  %v405_v16 = vmul.f32 %v403_v14, %v398_v12  ;;  %v1081_v12 = vld [vmem:[%s1620_s15] ss:$0 sm:$0xff]  ;;  %s1375_s15 = smov [#allocation9]  }
 0x3e5   :  { %v1082_v14 = vld [vmem:[%s1621_s16] ss:$0 sm:$0xff]  ;;  %s984_s16 = sshll.u32 %s1375_s15, 4  ;;  %s985_s16 = int_to_ptr.vmem [resolvable:$true] %s984_s16 }
 0x3e6   :  { %1257 = vrsqrt.f32 %v381_v15  ;;  %v407_v17 = vpack.c.bf16 %v405_v16, %v405_v16  ;;  %p1342_p11 = scmp.lt.s32.totalorder %s985_s16, %s985_s16 }
 0x3e8   :  { %846 = vmatprep.mubr.bf16.mxu0 %v407_v17  ;;  %887 = vmatprep.mubr.bf16.mxu1 %v407_v17 }
 0x3f0   :  { %v1258_v19 = vpop.eup %1257 }
 0x3f1   :  { %v383_v21 = vmul.f32 %v1258_v19, %v380_v18  ;;  %v1084_v19 = vld [vmem:[#allocation2] ss:$0 sm:$0xff] }
 0x3f3   :  { %v390_v23 = vmul.f32 %v1013_v20, %v383_v21 }
 0x3f5   :  { %v397_v24 = vadd.f32 %v1014_v22, %v390_v23  ;;  %v964_v22 = vand.u32 127, %v474_v26 }
 0x3f7   :  { %v406_v25 = vpack.c.bf16 %v397_v24, %v397_v24  ;;  %vm965_vm2 = vcmp.eq.s32.totalorder %v964_v22, 64 }
 0x3f8   :  { %v1085_v23 = vsel %vm965_vm2, 1.0, %v1372_v6 }
 0x3f9   :  { %847 = vmatmul.mubr.bf16.vlgmr.msra.gmra.mrb[4].mxu0 %v406_v25  ;;  %888 = vmatmul.mubr.bf16.vlgmr.msra.gmra.mrb[4].mxu1 %v406_v25  ;;  %v968_v24 = vsub.f32 1.0, %v1085_v23 }
 0x4cc   :  { %v848_v32 = vpop.f32.mrb[4].mxu0  ;;  %v889_v33 = vpop.f32.mrb[4].mxu1 }
 0x4cd   :  { %v849_v35 = vadd.f32 %v848_v32, %v477_v31  ;;  %v850_v36 = vpop.f32.mrb[5].mxu0  ;;  %v891_v37 = vpop.f32.mrb[5].mxu1  ;;  %v890_v55 = vadd.f32 %v889_v33, %v485_v51 }
 0x4ce   :  { %v852_v38 = vpop.f32.mrb[6].mxu0  ;;  %v893_v39 = vpop.f32.mrb[6].mxu1  ;;  %v851_v43 = vadd.f32 %v850_v36, %v481_v34  ;;  %v892_v53 = vadd.f32 %v891_v37, %v489_v50 }
 0x4cf   :  { %v1079_v40 = vmul.f32 -1.442695, %v849_v35  ;;  %v853_v41 = vpop.f32.mrb[7].mxu0  ;;  %v894_v42 = vpop.f32.mrb[7].mxu1 }
 0x4d0   :  { %v1080_v44 = vmul.f32 -1.442695, %v851_v43 }
 0x4d1   :  { %1259 = vpow2.f32 %v1079_v40 }
 0x4d2   :  { %1261 = vpow2.f32 %v1080_v44 }
 0x4db   :  { %v1260_v45 = vpop.eup %1259 }
 0x4dc   :  { %v899_v46 = vadd.f32 1.0, %v1260_v45  ;;  %v1262_v49 = vpop.eup %1261 }
 0x4dd   :  { %v905_v52 = vadd.f32 1.0, %v1262_v49 }
 0x4de   :  { %1263 = vrcp.f32 %v899_v46 }
 0x4df   :  { %1265 = vrcp.f32 %v905_v52 }
 0x4e8   :  { %v1264_v54 = vpop.eup %1263 }
 0x4e9   :  { %v908_v56 = vmul.f32 %v1264_v54, %v892_v53  ;;  %v1266_v58 = vpop.eup %1265 }
 0x4ea   :  { %v911_v59 = vsub.f32 1.0, %v1266_v58  ;;  %v913_v62 = vmul.f32 %v1266_v58, %v405_v16  ;;  %v1083_v16 = vld [vmem:[%s1622_s17] ss:$0 sm:$0xff]  ;;  %s1337_s17 = scalar_lea.vmem %s985_s16, 128 }
 0x4eb   :  { %v909_v57 = vadd.f32 %v908_v56, %v890_v55  ;;  %p1338_p10 = scmp.ne.s32.totalorder %s985_s16, %s1337_s17  ;;  %p1343_p12 = scmp.lt.s32.totalorder %s1337_s17, %s1337_s17 }
 0x4ed   :  { %1267 = vtanh.f32 %v909_v57  ;;  %p1344_p13 = por %p1343_p12, %p1342_p11 }
 0x4ef   :  { %p1345_p0 = pnand %p1344_p13, %p1338_p10 }
 0x4f7   :  { %v1268_v60 = vpop.eup %1267 }
 0x4f8   :  { %v912_v61 = vmul.f32 %v1268_v60, %v911_v59 }
 0x4fa   :  { %v914_v63 = vadd.f32 %v913_v62, %v912_v61 }
 0x4fc   :  { %917 = vadd.xlane.f32.xlu1 %v914_v63  ;;  %v919_v0 = vmul.f32 %v914_v63, %v914_v63  ;;  %v969_v27 = vmul.f32 %v968_v24, %v914_v63 }
 0x500   :  { %920 = vadd.xlane.f32.xlu1 %v919_v0 }
 0x589   :  { %v918_v1 = vpop.xlane.xlu1 %917 }
 0x58a   :  { %v922_v2 = vmul.f32 0.015625, %v918_v1 }
 0x58c   :  { %v924_v4 = vmul.f32 %v922_v2, %v922_v2  ;;  %v927_v10 = vsub.f32 %v914_v63, %v922_v2 }
 0x58d   :  { %v921_v3 = vpop.xlane.xlu1 %920 }
 0x58e   :  { %v923_v5 = vmul.f32 0.015625, %v921_v3 }
 0x590   :  { %v925_v7 = vsub.f32 %v923_v5, %v924_v4 }
 0x592   :  { %v926_v8 = vmax.f32 %v925_v7, 0.0 }
 0x594   :  { %v928_v9 = vadd.f32 1e-05, %v926_v8 }
 0x596   :  { %1269 = vrsqrt.f32 %v928_v9 }
 0x5a0   :  { %v1270_v11 = vpop.eup %1269 }
 0x5a1   :  { %v930_v13 = vmul.f32 %v1270_v11, %v927_v10 }
 0x5a3   :  { %v937_v15 = vmul.f32 %v1081_v12, %v930_v13 }
 0x5a5   :  { %v944_v17 = vadd.f32 %v1082_v14, %v937_v15 }
 0x5a7   :  { %v952_v18 = vmul.f32 %v1083_v16, %v944_v17 }
 0x5a9   :  { %953 = vadd.xlane.f32.xlu1 %v952_v18 }
 0x636   :  { %v954_v20 = vpop.xlane.xlu1 %953 }
 0x637   :  { %v962_v21 = vadd.f32 %v1084_v19, %v954_v20 }
 0x639   :  { %972 = vperm.xlu1 %1144, %v962_v21  }
 0x6b8   :  { %v973_v25 = vpop.permute.xlu1 %972 }
 0x6b9   :  { %v975_v28 = vmul.f32 %v1085_v23, %v973_v25 }
 0x6bb   :  { %v976_v29 = vadd.f32 %v975_v28, %v969_v27 }
 0x6bd   :  { %977 = vst [vmem:[#allocation9] sm:$0xff] %v976_v29 }
 0x6be   :  { %1348 = shalt.err (!%p1345_p0)
}
 0x6bf   :  { %s1349_s20 = scalar_lea.hbm %s1624_s19, 128 }
 0x6c0   :  { %p1350_p1 = scmp.ne.s32.totalorder %s1624_s19, %s1349_s20  ;;  %p1353_p2 = scmp.lt.u32.totalorder %s1349_s20, %s1624_s19 }
 0x6c2   :  { %p1355_p3 = pnand %p1353_p2, %p1350_p1 }
 0x6c4   :  { %1358 = shalt.err (!%p1355_p3)
}
 0x6c5   :  { %987 = dma.vmem_to_hbm [thread:$0]  %s985_s16, 128, %s1624_s19, [#allocation5]  }
 0x6c6   :  { %1363 = dma.done.wait [#allocation5], 128  }
 0x6c7   :  { %1364 = vsyncadd [#allocation5], 4294967168 }
 0x6c8   :  { %991 = vsyncpa [#allocation4], 1 }
 0x6c9   :  { %992 = vsyncpa [#allocation7], 1 }
 0x6ca   :  { %993 = vsyncpa [#allocation5], 1 }

</bundles_post_ra>
